<compile_context>
chip_gen: v7x
topology: tpu7x:2x2x1
jax: 0.10.0
libtpu: 0.0.40
codegen_flags: <defaults>
</compile_context>

<pallas_src>
import jax
import jax.numpy as jnp
from jax.experimental import pallas as pl
from jax.experimental.pallas import tpu as pltpu


def _round_up(x, m):
    return ((x + m - 1) // m) * m


def _make_kernel(bt, c_in, use_vpu, compute_dtype):
    def kernel(x_ref, w_ref, b_ref, o_ref):
        # x_ref: (Bt, C_in, TN)  w_ref: (C_out, C_in)  b_ref: (C_out, 1) f32
        # o_ref: (Bt, C_out, TN)
        w = w_ref[...]
        b = b_ref[...]                                    # (C_out, 1) f32
        c_out, tn = o_ref.shape[1], o_ref.shape[2]
        if use_vpu:
            # Hoist the bias broadcast out of the (unrolled) loops.
            b_full = jnp.broadcast_to(b, (c_out, tn)).astype(jnp.float32)
            wf = w.astype(jnp.float32)
        for i in range(bt):                               # static, unrolled
            x = x_ref[i]                                  # (C_in, TN)
            if use_vpu:
                # K tiny (<=4): contraction as broadcasted multiply-adds on
                # the VPU; the kernel stays purely HBM-bound.
                xf = x.astype(jnp.float32)
                acc = b_full
                for k in range(c_in):                     # static, unrolled
                    acc = acc + wf[:, k:k + 1] * xf[k:k + 1, :]
                o_ref[i] = acc.astype(o_ref.dtype)
            else:
                if compute_dtype is not None:
                    x = x.astype(compute_dtype)           # post-load cast only
                acc = jnp.dot(w, x, preferred_element_type=jnp.float32)
                o_ref[i] = (acc + b).astype(o_ref.dtype)
    return kernel


def linear_1x1_conv(x_nchw, weight, bias, *, tn=None, compute_dtype=None):
    """1x1 Conv2d with bias (== per-pixel linear layer).

    x_nchw : [B, C_in, H, W]
    weight : [C_out, C_in, 1, 1]   (PyTorch Conv2d weight layout)
    bias   : [C_out]
    tn     : optional spatial (lane) tile hint; rounded to a multiple of 128.
    compute_dtype : optional MXU compute dtype (e.g. jnp.bfloat16). Only the
                    (tiny, VMEM-resident) weight is cast in the wrapper; x is
                    cast after load inside the kernel, so HBM traffic for x is
                    unchanged. Accumulation and bias add stay in f32.
    returns: [B, C_out, H, W]
    """
    B, C_in, H, W = x_nchw.shape
    C_out = weight.shape[0]
    HW = H * W
    out_dtype = x_nchw.dtype

    x3 = x_nchw.reshape(B, C_in, HW)                  # contiguous, no transpose
    w_mat = weight.reshape(C_out, C_in)
    if compute_dtype is not None:
        w_mat = w_mat.astype(compute_dtype)           # tiny + resident => free
    b_col = bias.reshape(C_out, 1).astype(jnp.float32)

    # Pad spatial only to a multiple of 128 (<=127 garbage lanes, no extra
    # HBM pass for common multiples-of-128 spatial extents).
    HWp = _round_up(HW, 128)
    if HWp != HW:
        x3 = jnp.pad(x3, ((0, 0), (0, 0), (0, HWp - HW)))

    isize = jnp.dtype(x3.dtype).itemsize
    wsize = jnp.dtype(w_mat.dtype).itemsize
    osize = jnp.dtype(out_dtype).itemsize
    w_bytes = C_out * C_in * wsize + C_out * 4        # weight + bias blocks

    # Generation-aware VMEM budget (v7x has only 64 MiB per TensorCore).
    try:
        vmem_cap = int(pltpu.get_tpu_info().vmem_capacity_bytes)
    except Exception:
        vmem_cap = 64 * 1024 * 1024                   # conservative (v7x)
    vmem_budget = int(0.85 * vmem_cap)

    def fits(bt_, tn_):
        # 2x (x block + out block) double-buffered + up to 2x (W + bias).
        return 2 * bt_ * tn_ * (C_in * isize + C_out * osize) + 2 * w_bytes \
            <= vmem_budget

    # Largest lane tile that divides the 128-padded extent and fits VMEM.
    if tn is None:
        candidates = (2048, 1024, 512, 256, 128)
    else:
        tn = max(128, _round_up(int(tn), 128))
        candidates = (tn, 2048, 1024, 512, 256, 128)
    tile = 128
    for c in candidates:
        if c <= HWp and HWp % c == 0 and fits(1, c):
            tile = c
            break
    tn = tile
    n_sp = HWp // tn

    # Batch blocking: when the whole image fits in one spatial tile, process
    # several images per grid step to amortize the ~0.35us/step overhead.
    # Keep >=2 grid steps when the batch allows (v7x has 2 TensorCores) unless
    # even a full-batch step is below ~1 MiB of HBM traffic.
    bt = 1
    if n_sp == 1 and B > 1:
        step_bytes = tn * (C_in * isize + C_out * osize)
        target = 1 << 20
        for cand in sorted((d for d in range(1, min(B, 8) + 1) if B % d == 0),
                           reverse=True):
            if not fits(cand, tn):
                continue
            if (B // cand) >= 2 or cand * step_bytes <= target:
                bt = cand
                break
    grid = (B // bt, n_sp)

    xo_bytes = bt * tn * (C_in * isize + C_out * osize)
    needed = 2 * xo_bytes + 2 * w_bytes
    vmem_limit = int(min(max(int(needed * 1.5), 16 * 1024 * 1024), vmem_budget))

    use_vpu = C_in <= 4     # MXU for everything bigger (VALU saturates early)

    cost = pl.CostEstimate(
        flops=2 * B * HWp * C_in * C_out,
        transcendentals=0,
        bytes_accessed=(x3.size * isize + w_mat.size * wsize
                        + b_col.size * 4 + B * C_out * HWp * osize),
    )

    def _build(single_buffer_consts):
        const_kwargs = ({"pipeline_mode": pl.Buffered(1)}
                        if single_buffer_consts else {})
        return pl.pallas_call(
            _make_kernel(bt, C_in, use_vpu, compute_dtype),
            out_shape=jax.ShapeDtypeStruct((B, C_out, HWp), out_dtype),
            grid_spec=pltpu.PrefetchScalarGridSpec(
                num_scalar_prefetch=0,
                grid=grid,
                in_specs=[
                    pl.BlockSpec((bt, C_in, tn), lambda b, j: (b, 0, j)),
                    pl.BlockSpec((C_out, C_in), lambda b, j: (0, 0),
                                 **const_kwargs),
                    pl.BlockSpec((C_out, 1), lambda b, j: (0, 0),
                                 **const_kwargs),
                ],
                out_specs=pl.BlockSpec((bt, C_out, tn), lambda b, j: (b, 0, j)),
            ),
            compiler_params=pltpu.CompilerParams(
                dimension_semantics=("parallel", "parallel"),
                vmem_limit_bytes=vmem_limit,
            ),
            cost_estimate=cost,
        )

    try:
        # Constant-index weight/bias -> single buffered (saves VMEM, esp. v7x).
        out3 = _build(True)(x3, w_mat, b_col)
        out3 = jax.block_until_ready(out3)
    except Exception:
        # Fallback: default (double) buffering for the constant operands.
        out3 = _build(False)(x3, w_mat, b_col)

    if HWp != HW:
        out3 = out3[:, :, :HW]                        # drop spatial padding
    return out3.reshape(B, C_out, H, W)


if __name__ == "__main__":
    key = jax.random.PRNGKey(0)
    k_x, k_w, k_b = jax.random.split(key, 3)

    B, C_in, C_out, Hs, Ws = 2, 4, 8, 16, 16

    x = jax.random.normal(k_x, (B, C_in, Hs, Ws), dtype=jnp.float32)
    # Conv2d weight layout: [C_out, C_in, 1, 1]
    weight = jax.random.normal(k_w, (C_out, C_in, 1, 1), dtype=jnp.float32) * 0.1
    bias = jax.random.normal(k_b, (C_out,), dtype=jnp.float32) * 0.1

    out = linear_1x1_conv(x, weight, bias)
    out = jax.block_until_ready(out)

    # Reference check in plain JAX (1x1 conv == per-pixel linear).
    ref = jnp.einsum("bchw,oc->bohw", x, weight.reshape(C_out, C_in)) \
        + bias[None, :, None, None]
    assert out.shape == (B, C_out, Hs, Ws)
    assert jnp.allclose(out, ref, atol=1e-5), "mismatch vs reference"

    print("KERNEL_OK")
</pallas_src>

<mosaic_0001>
module attributes {stable_mosaic.version = 11 : i64} {
  func.func @kernel(%arg0: i32, %arg1: i32, %arg2: memref<2x4x256xf32, #tpu.memory_space<vmem>>, %arg3: memref<8x4xf32, #tpu.memory_space<vmem>>, %arg4: memref<8x1xf32, #tpu.memory_space<vmem>>, %arg5: memref<2x8x256xf32, #tpu.memory_space<vmem>>) attributes {dimension_semantics = [#tpu.dimension_semantics<parallel>, #tpu.dimension_semantics<parallel>], iteration_bounds = array<i64: 1, 1>, scalar_prefetch = 0 : i64, scratch_operands = 0 : i64, tpu.core_type = #tpu.core_type<tc>, window_params = [{transform_indices = @transform_0, window_bounds = array<i64: 2, 4, 256>}, {pipeline_mode = #tpu.pipeline_mode<synchronous>, transform_indices = @transform_1, window_bounds = array<i64: 8, 4>}, {pipeline_mode = #tpu.pipeline_mode<synchronous>, transform_indices = @transform_2, window_bounds = array<i64: 8, 1>}, {transform_indices = @transform_3, window_bounds = array<i64: 2, 8, 256>}]} {
    %c0 = arith.constant 0 : index
    %c0_0 = arith.constant 0 : index
    %0 = vector.load %arg3[%c0, %c0_0] : memref<8x4xf32, #tpu.memory_space<vmem>>, vector<8x4xf32>
    %c0_1 = arith.constant 0 : index
    %c0_2 = arith.constant 0 : index
    %1 = vector.load %arg4[%c0_1, %c0_2] : memref<8x1xf32, #tpu.memory_space<vmem>>, vector<8x1xf32>
    %2 = vector.shape_cast %1 : vector<8x1xf32> to vector<8x1xf32>
    %3 = vector.broadcast %2 : vector<8x1xf32> to vector<8x256xf32>
    %c0_3 = arith.constant 0 : index
    %c0_4 = arith.constant 0 : index
    %c0_5 = arith.constant 0 : index
    %4 = vector.load %arg2[%c0_3, %c0_4, %c0_5] : memref<2x4x256xf32, #tpu.memory_space<vmem>>, vector<1x4x256xf32>
    %5 = vector.shape_cast %4 : vector<1x4x256xf32> to vector<4x256xf32>
    %6 = vector.extract_strided_slice %0 {offsets = [0, 0], sizes = [8, 1], strides = [1, 1]} : vector<8x4xf32> to vector<8x1xf32>
    %7 = vector.extract_strided_slice %5 {offsets = [0, 0], sizes = [1, 256], strides = [1, 1]} : vector<4x256xf32> to vector<1x256xf32>
    %8 = vector.broadcast %6 : vector<8x1xf32> to vector<8x256xf32>
    %9 = vector.broadcast %7 : vector<1x256xf32> to vector<8x256xf32>
    %10 = arith.mulf %8, %9 : vector<8x256xf32>
    %11 = arith.addf %3, %10 : vector<8x256xf32>
    %12 = vector.extract_strided_slice %0 {offsets = [0, 1], sizes = [8, 1], strides = [1, 1]} : vector<8x4xf32> to vector<8x1xf32>
    %13 = vector.extract_strided_slice %5 {offsets = [1, 0], sizes = [1, 256], strides = [1, 1]} : vector<4x256xf32> to vector<1x256xf32>
    %14 = vector.broadcast %12 : vector<8x1xf32> to vector<8x256xf32>
    %15 = vector.broadcast %13 : vector<1x256xf32> to vector<8x256xf32>
    %16 = arith.mulf %14, %15 : vector<8x256xf32>
    %17 = arith.addf %11, %16 : vector<8x256xf32>
    %18 = vector.extract_strided_slice %0 {offsets = [0, 2], sizes = [8, 1], strides = [1, 1]} : vector<8x4xf32> to vector<8x1xf32>
    %19 = vector.extract_strided_slice %5 {offsets = [2, 0], sizes = [1, 256], strides = [1, 1]} : vector<4x256xf32> to vector<1x256xf32>
    %20 = vector.broadcast %18 : vector<8x1xf32> to vector<8x256xf32>
    %21 = vector.broadcast %19 : vector<1x256xf32> to vector<8x256xf32>
    %22 = arith.mulf %20, %21 : vector<8x256xf32>
    %23 = arith.addf %17, %22 : vector<8x256xf32>
    %24 = vector.extract_strided_slice %0 {offsets = [0, 3], sizes = [8, 1], strides = [1, 1]} : vector<8x4xf32> to vector<8x1xf32>
    %25 = vector.extract_strided_slice %5 {offsets = [3, 0], sizes = [1, 256], strides = [1, 1]} : vector<4x256xf32> to vector<1x256xf32>
    %26 = vector.broadcast %24 : vector<8x1xf32> to vector<8x256xf32>
    %27 = vector.broadcast %25 : vector<1x256xf32> to vector<8x256xf32>
    %28 = arith.mulf %26, %27 : vector<8x256xf32>
    %29 = arith.addf %23, %28 : vector<8x256xf32>
    %c0_6 = arith.constant 0 : index
    %c0_7 = arith.constant 0 : index
    %c0_8 = arith.constant 0 : index
    %30 = vector.load %arg5[%c0_6, %c0_7, %c0_8] : memref<2x8x256xf32, #tpu.memory_space<vmem>>, vector<1x8x256xf32>
    %31 = vector.shape_cast %30 : vector<1x8x256xf32> to vector<8x256xf32>
    %32 = vector.shape_cast %29 : vector<8x256xf32> to vector<1x8x256xf32>
    tpu.vector_store %arg5[%c0_6, %c0_7, %c0_8], %32 {strides = array<i32>} : memref<2x8x256xf32, #tpu.memory_space<vmem>>, vector<1x8x256xf32>,
    %c1 = arith.constant 1 : index
    %c0_9 = arith.constant 0 : index
    %c0_10 = arith.constant 0 : index
    %33 = vector.load %arg2[%c1, %c0_9, %c0_10] : memref<2x4x256xf32, #tpu.memory_space<vmem>>, vector<1x4x256xf32>
    %34 = vector.shape_cast %33 : vector<1x4x256xf32> to vector<4x256xf32>
    %35 = vector.extract_strided_slice %0 {offsets = [0, 0], sizes = [8, 1], strides = [1, 1]} : vector<8x4xf32> to vector<8x1xf32>
    %36 = vector.extract_strided_slice %34 {offsets = [0, 0], sizes = [1, 256], strides = [1, 1]} : vector<4x256xf32> to vector<1x256xf32>
    %37 = vector.broadcast %35 : vector<8x1xf32> to vector<8x256xf32>
    %38 = vector.broadcast %36 : vector<1x256xf32> to vector<8x256xf32>
    %39 = arith.mulf %37, %38 : vector<8x256xf32>
    %40 = arith.addf %3, %39 : vector<8x256xf32>
    %41 = vector.extract_strided_slice %0 {offsets = [0, 1], sizes = [8, 1], strides = [1, 1]} : vector<8x4xf32> to vector<8x1xf32>
    %42 = vector.extract_strided_slice %34 {offsets = [1, 0], sizes = [1, 256], strides = [1, 1]} : vector<4x256xf32> to vector<1x256xf32>
    %43 = vector.broadcast %41 : vector<8x1xf32> to vector<8x256xf32>
    %44 = vector.broadcast %42 : vector<1x256xf32> to vector<8x256xf32>
    %45 = arith.mulf %43, %44 : vector<8x256xf32>
    %46 = arith.addf %40, %45 : vector<8x256xf32>
    %47 = vector.extract_strided_slice %0 {offsets = [0, 2], sizes = [8, 1], strides = [1, 1]} : vector<8x4xf32> to vector<8x1xf32>
    %48 = vector.extract_strided_slice %34 {offsets = [2, 0], sizes = [1, 256], strides = [1, 1]} : vector<4x256xf32> to vector<1x256xf32>
    %49 = vector.broadcast %47 : vector<8x1xf32> to vector<8x256xf32>
    %50 = vector.broadcast %48 : vector<1x256xf32> to vector<8x256xf32>
    %51 = arith.mulf %49, %50 : vector<8x256xf32>
    %52 = arith.addf %46, %51 : vector<8x256xf32>
    %53 = vector.extract_strided_slice %0 {offsets = [0, 3], sizes = [8, 1], strides = [1, 1]} : vector<8x4xf32> to vector<8x1xf32>
    %54 = vector.extract_strided_slice %34 {offsets = [3, 0], sizes = [1, 256], strides = [1, 1]} : vector<4x256xf32> to vector<1x256xf32>
    %55 = vector.broadcast %53 : vector<8x1xf32> to vector<8x256xf32>
    %56 = vector.broadcast %54 : vector<1x256xf32> to vector<8x256xf32>
    %57 = arith.mulf %55, %56 : vector<8x256xf32>
    %58 = arith.addf %52, %57 : vector<8x256xf32>
    %c1_11 = arith.constant 1 : index
    %c0_12 = arith.constant 0 : index
    %c0_13 = arith.constant 0 : index
    %59 = vector.load %arg5[%c1_11, %c0_12, %c0_13] : memref<2x8x256xf32, #tpu.memory_space<vmem>>, vector<1x8x256xf32>
    %60 = vector.shape_cast %59 : vector<1x8x256xf32> to vector<8x256xf32>
    %61 = vector.shape_cast %58 : vector<8x256xf32> to vector<1x8x256xf32>
    tpu.vector_store %arg5[%c1_11, %c0_12, %c0_13], %61 {strides = array<i32>} : memref<2x8x256xf32, #tpu.memory_space<vmem>>, vector<1x8x256xf32>,
    return
  }
  func.func @transform_0(%arg0: i32, %arg1: i32) -> (i32, i32, i32) {
    %c0_i32 = arith.constant 0 : i32
    %c0_i32_0 = arith.constant 0 : i32
    return %arg0, %c0_i32, %arg1 : i32, i32, i32
  }
  func.func @transform_1(%arg0: i32, %arg1: i32) -> (i32, i32) {
    %c0_i32 = arith.constant 0 : i32
    %c0_i32_0 = arith.constant 0 : i32
    %c0_i32_1 = arith.constant 0 : i32
    return %c0_i32, %c0_i32_0 : i32, i32
  }
  func.func @transform_2(%arg0: i32, %arg1: i32) -> (i32, i32) {
    %c0_i32 = arith.constant 0 : i32
    %c0_i32_0 = arith.constant 0 : i32
    %c0_i32_1 = arith.constant 0 : i32
    return %c0_i32, %c0_i32_0 : i32, i32
  }
  func.func @transform_3(%arg0: i32, %arg1: i32) -> (i32, i32, i32) {
    %c0_i32 = arith.constant 0 : i32
    %c0_i32_0 = arith.constant 0 : i32
    return %arg0, %c0_i32, %arg1 : i32, i32, i32
  }
}

module attributes {stable_mosaic.version = 11 : i64} {
  func.func @kernel(%arg0: i32, %arg1: i32, %arg2: memref<2x4x256xf32, #tpu.memory_space<vmem>>, %arg3: memref<8x4xf32, #tpu.memory_space<vmem>>, %arg4: memref<8x1xf32, #tpu.memory_space<vmem>>, %arg5: memref<2x8x256xf32, #tpu.memory_space<vmem>>) attributes {dimension_semantics = [#tpu.dimension_semantics<parallel>, #tpu.dimension_semantics<parallel>], iteration_bounds = array<i64: 1, 1>, scalar_prefetch = 0 : i64, scratch_operands = 0 : i64, tpu.core_type = #tpu.core_type<tc>, window_params = [{transform_indices = @transform_0, window_bounds = array<i64: 2, 4, 256>}, {pipeline_mode = #tpu.pipeline_mode<synchronous>, transform_indices = @transform_1, window_bounds = array<i64: 8, 4>}, {pipeline_mode = #tpu.pipeline_mode<synchronous>, transform_indices = @transform_2, window_bounds = array<i64: 8, 1>}, {transform_indices = @transform_3, window_bounds = array<i64: 2, 8, 256>}]} {
    %c0 = arith.constant 0 : index
    %c0_0 = arith.constant 0 : index
    %0 = vector.load %arg3[%c0, %c0_0] : memref<8x4xf32, #tpu.memory_space<vmem>>, vector<8x4xf32>
    %c0_1 = arith.constant 0 : index
    %c0_2 = arith.constant 0 : index
    %1 = vector.load %arg4[%c0_1, %c0_2] : memref<8x1xf32, #tpu.memory_space<vmem>>, vector<8x1xf32>
    %2 = vector.shape_cast %1 : vector<8x1xf32> to vector<8x1xf32>
    %3 = vector.broadcast %2 : vector<8x1xf32> to vector<8x256xf32>
    %c0_3 = arith.constant 0 : index
    %c0_4 = arith.constant 0 : index
    %c0_5 = arith.constant 0 : index
    %4 = vector.load %arg2[%c0_3, %c0_4, %c0_5] : memref<2x4x256xf32, #tpu.memory_space<vmem>>, vector<1x4x256xf32>
    %5 = vector.shape_cast %4 : vector<1x4x256xf32> to vector<4x256xf32>
    %6 = vector.extract_strided_slice %0 {offsets = [0, 0], sizes = [8, 1], strides = [1, 1]} : vector<8x4xf32> to vector<8x1xf32>
    %7 = vector.extract_strided_slice %5 {offsets = [0, 0], sizes = [1, 256], strides = [1, 1]} : vector<4x256xf32> to vector<1x256xf32>
    %8 = vector.broadcast %6 : vector<8x1xf32> to vector<8x256xf32>
    %9 = vector.broadcast %7 : vector<1x256xf32> to vector<8x256xf32>
    %10 = arith.mulf %8, %9 : vector<8x256xf32>
    %11 = arith.addf %3, %10 : vector<8x256xf32>
    %12 = vector.extract_strided_slice %0 {offsets = [0, 1], sizes = [8, 1], strides = [1, 1]} : vector<8x4xf32> to vector<8x1xf32>
    %13 = vector.extract_strided_slice %5 {offsets = [1, 0], sizes = [1, 256], strides = [1, 1]} : vector<4x256xf32> to vector<1x256xf32>
    %14 = vector.broadcast %12 : vector<8x1xf32> to vector<8x256xf32>
    %15 = vector.broadcast %13 : vector<1x256xf32> to vector<8x256xf32>
    %16 = arith.mulf %14, %15 : vector<8x256xf32>
    %17 = arith.addf %11, %16 : vector<8x256xf32>
    %18 = vector.extract_strided_slice %0 {offsets = [0, 2], sizes = [8, 1], strides = [1, 1]} : vector<8x4xf32> to vector<8x1xf32>
    %19 = vector.extract_strided_slice %5 {offsets = [2, 0], sizes = [1, 256], strides = [1, 1]} : vector<4x256xf32> to vector<1x256xf32>
    %20 = vector.broadcast %18 : vector<8x1xf32> to vector<8x256xf32>
    %21 = vector.broadcast %19 : vector<1x256xf32> to vector<8x256xf32>
    %22 = arith.mulf %20, %21 : vector<8x256xf32>
    %23 = arith.addf %17, %22 : vector<8x256xf32>
    %24 = vector.extract_strided_slice %0 {offsets = [0, 3], sizes = [8, 1], strides = [1, 1]} : vector<8x4xf32> to vector<8x1xf32>
    %25 = vector.extract_strided_slice %5 {offsets = [3, 0], sizes = [1, 256], strides = [1, 1]} : vector<4x256xf32> to vector<1x256xf32>
    %26 = vector.broadcast %24 : vector<8x1xf32> to vector<8x256xf32>
    %27 = vector.broadcast %25 : vector<1x256xf32> to vector<8x256xf32>
    %28 = arith.mulf %26, %27 : vector<8x256xf32>
    %29 = arith.addf %23, %28 : vector<8x256xf32>
    %c0_6 = arith.constant 0 : index
    %c0_7 = arith.constant 0 : index
    %c0_8 = arith.constant 0 : index
    %30 = vector.load %arg5[%c0_6, %c0_7, %c0_8] : memref<2x8x256xf32, #tpu.memory_space<vmem>>, vector<1x8x256xf32>
    %31 = vector.shape_cast %30 : vector<1x8x256xf32> to vector<8x256xf32>
    %32 = vector.shape_cast %29 : vector<8x256xf32> to vector<1x8x256xf32>
    tpu.vector_store %arg5[%c0_6, %c0_7, %c0_8], %32 {strides = array<i32>} : memref<2x8x256xf32, #tpu.memory_space<vmem>>, vector<1x8x256xf32>,
    %c1 = arith.constant 1 : index
    %c0_9 = arith.constant 0 : index
    %c0_10 = arith.constant 0 : index
    %33 = vector.load %arg2[%c1, %c0_9, %c0_10] : memref<2x4x256xf32, #tpu.memory_space<vmem>>, vector<1x4x256xf32>
    %34 = vector.shape_cast %33 : vector<1x4x256xf32> to vector<4x256xf32>
    %35 = vector.extract_strided_slice %0 {offsets = [0, 0], sizes = [8, 1], strides = [1, 1]} : vector<8x4xf32> to vector<8x1xf32>
    %36 = vector.extract_strided_slice %34 {offsets = [0, 0], sizes = [1, 256], strides = [1, 1]} : vector<4x256xf32> to vector<1x256xf32>
    %37 = vector.broadcast %35 : vector<8x1xf32> to vector<8x256xf32>
    %38 = vector.broadcast %36 : vector<1x256xf32> to vector<8x256xf32>
    %39 = arith.mulf %37, %38 : vector<8x256xf32>
    %40 = arith.addf %3, %39 : vector<8x256xf32>
    %41 = vector.extract_strided_slice %0 {offsets = [0, 1], sizes = [8, 1], strides = [1, 1]} : vector<8x4xf32> to vector<8x1xf32>
    %42 = vector.extract_strided_slice %34 {offsets = [1, 0], sizes = [1, 256], strides = [1, 1]} : vector<4x256xf32> to vector<1x256xf32>
    %43 = vector.broadcast %41 : vector<8x1xf32> to vector<8x256xf32>
    %44 = vector.broadcast %42 : vector<1x256xf32> to vector<8x256xf32>
    %45 = arith.mulf %43, %44 : vector<8x256xf32>
    %46 = arith.addf %40, %45 : vector<8x256xf32>
    %47 = vector.extract_strided_slice %0 {offsets = [0, 2], sizes = [8, 1], strides = [1, 1]} : vector<8x4xf32> to vector<8x1xf32>
    %48 = vector.extract_strided_slice %34 {offsets = [2, 0], sizes = [1, 256], strides = [1, 1]} : vector<4x256xf32> to vector<1x256xf32>
    %49 = vector.broadcast %47 : vector<8x1xf32> to vector<8x256xf32>
    %50 = vector.broadcast %48 : vector<1x256xf32> to vector<8x256xf32>
    %51 = arith.mulf %49, %50 : vector<8x256xf32>
    %52 = arith.addf %46, %51 : vector<8x256xf32>
    %53 = vector.extract_strided_slice %0 {offsets = [0, 3], sizes = [8, 1], strides = [1, 1]} : vector<8x4xf32> to vector<8x1xf32>
    %54 = vector.extract_strided_slice %34 {offsets = [3, 0], sizes = [1, 256], strides = [1, 1]} : vector<4x256xf32> to vector<1x256xf32>
    %55 = vector.broadcast %53 : vector<8x1xf32> to vector<8x256xf32>
    %56 = vector.broadcast %54 : vector<1x256xf32> to vector<8x256xf32>
    %57 = arith.mulf %55, %56 : vector<8x256xf32>
    %58 = arith.addf %52, %57 : vector<8x256xf32>
    %c1_11 = arith.constant 1 : index
    %c0_12 = arith.constant 0 : index
    %c0_13 = arith.constant 0 : index
    %59 = vector.load %arg5[%c1_11, %c0_12, %c0_13] : memref<2x8x256xf32, #tpu.memory_space<vmem>>, vector<1x8x256xf32>
    %60 = vector.shape_cast %59 : vector<1x8x256xf32> to vector<8x256xf32>
    %61 = vector.shape_cast %58 : vector<8x256xf32> to vector<1x8x256xf32>
    tpu.vector_store %arg5[%c1_11, %c0_12, %c0_13], %61 {strides = array<i32>} : memref<2x8x256xf32, #tpu.memory_space<vmem>>, vector<1x8x256xf32>,
    return
  }
  func.func @transform_0(%arg0: i32, %arg1: i32) -> (i32, i32, i32) {
    %c0_i32 = arith.constant 0 : i32
    %c0_i32_0 = arith.constant 0 : i32
    return %arg0, %c0_i32, %arg1 : i32, i32, i32
  }
  func.func @transform_1(%arg0: i32, %arg1: i32) -> (i32, i32) {
    %c0_i32 = arith.constant 0 : i32
    %c0_i32_0 = arith.constant 0 : i32
    %c0_i32_1 = arith.constant 0 : i32
    return %c0_i32, %c0_i32_0 : i32, i32
  }
  func.func @transform_2(%arg0: i32, %arg1: i32) -> (i32, i32) {
    %c0_i32 = arith.constant 0 : i32
    %c0_i32_0 = arith.constant 0 : i32
    %c0_i32_1 = arith.constant 0 : i32
    return %c0_i32, %c0_i32_0 : i32, i32
  }
  func.func @transform_3(%arg0: i32, %arg1: i32) -> (i32, i32, i32) {
    %c0_i32 = arith.constant 0 : i32
    %c0_i32_0 = arith.constant 0 : i32
    return %arg0, %c0_i32, %arg1 : i32, i32, i32
  }
}

</mosaic_0001>

<bundles_post_ra>
// kernel: tpu_custom_call.1
= control target key start
LH: loop header
LB: loop body
LE: loop exit
PB: predicated region body
PF: predicated region fallthrough
CT: control target
= control target key end

     0   :  { %v277_v1 = vmov 0   ;;  %v278_v2 = vmov 1   ;;  %s336_s0 = inlined_call_operand.vmem [shape: f32[2,4,256], index: 0, kind: input, shape index: {}]   ;;  %s337_s1 = inlined_call_operand.vmem [shape: f32[8,4], index: 1, kind: input, shape index: {}]   ;;  %s338_s2 = inlined_call_operand.vmem [shape: f32[8,1], index: 2, kind: input, shape index: {}]   ;;  %s339_s3 = inlined_call_operand.hbm [shape: f32[2,8,256], index: 3, kind: output, shape index: {}]  }
   0x1   :  { %v15_v0 = vld [vmem:[%s337_s1] sm:$0xff]  ;;  %249 = vset.pattern.permute.xlu0 %v277_v1  ;;  %250 = vset.pattern.permute.xlu1 %v278_v2 }
   0x2   :  { %8 = vsyncpa [#allocation3], 0  ;;  %25 = vperm.xlu0 %249, %v15_v0   ;;  %52 = vperm.xlu1 %250, %v15_v0   ;;  %v16_v3 = vld [vmem:[%s338_s2] sm:$0xff]  ;;  %v279_v4 = vmov 2   ;;  %v280_v5 = vmov 3   ;;  %v29_v6 = vlaneseq  ;;  %v241_v11 = vld [vmem:[%s336_s0 + $0x8] sm:$0xff] }
   0x3   :  { %v22_v10 = vld [vmem:[%s336_s0] sm:$0xff]  ;;  %s281_s0 = smov [#allocation2]  }
   0x4   :  { %v30_v7 = vshrl.u32 %v29_v6, 7  ;;  %s230_s2 = sshll.u32 %s281_s0, 4  ;;  %s231_s2 = int_to_ptr.vmem [resolvable:$true] %s230_s2 }
   0x5   :  { %s253_s19 = scalar_lea.vmem %s231_s2, 512  ;;  %p258_p1 = scmp.lt.s32.totalorder %s231_s2, %s231_s2 }
   0x6   :  { %19 = vperm.xlu0 %249, %v16_v3   ;;  %251 = vset.pattern.permute.xlu1 %v279_v4  ;;  %v31_v8 = vsub.s32 0, %v30_v7  ;;  %v35_v9 = vsub.s32 4, %v30_v7  ;;  %v57_v12 = vsub.s32 1, %v30_v7  ;;  %v61_v13 = vsub.s32 5, %v30_v7  ;;  %p254_p0 = scmp.ne.s32.totalorder %s231_s2, %s253_s19  ;;  %p259_p2 = scmp.lt.s32.totalorder %s253_s19, %s253_s19 }
   0x7   :  { %78 = vperm.xlu1 %251, %v15_v0   ;;  %v83_v14 = vsub.s32 2, %v30_v7  ;;  %v87_v15 = vsub.s32 6, %v30_v7  ;;  %v316_v16 = vsub.s32 3, %v30_v7  ;;  %v113_v17 = vsub.s32 7, %v30_v7 }
   0x8   :  { %v32_v18 = vrot.slane %v22_v10, %v31_v8  ;;  %v36_v19 = vrot.slane %v22_v10, %v35_v9  ;;  %v137_v20 = vrot.slane %v241_v11, %v31_v8  ;;  %v141_v21 = vrot.slane %v241_v11, %v35_v9  ;;  %p260_p3 = por %p259_p2, %p258_p1 }
   0x9   :  { %v58_v22 = vrot.slane %v22_v10, %v57_v12  ;;  %v62_v23 = vrot.slane %v22_v10, %v61_v13  ;;  %v159_v24 = vrot.slane %v241_v11, %v57_v12  ;;  %v163_v25 = vrot.slane %v241_v11, %v61_v13 }
   0xa   :  { %252 = vset.pattern.permute.xlu0 %v280_v5  ;;  %v84_v26 = vrot.slane %v22_v10, %v83_v14  ;;  %v88_v27 = vrot.slane %v22_v10, %v87_v15  ;;  %v181_v28 = vrot.slane %v241_v11, %v83_v14  ;;  %v185_v29 = vrot.slane %v241_v11, %v87_v15  ;;  %p261_p4 = pnand %p260_p3, %p254_p0 }
   0xb   :  { %104 = vperm.xlu0 %252, %v15_v0   ;;  %v110_v30 = vrot.slane %v22_v10, %v316_v16  ;;  %v114_v31 = vrot.slane %v22_v10, %v113_v17  ;;  %v203_v32 = vrot.slane %v241_v11, %v316_v16  ;;  %v207_v33 = vrot.slane %v241_v11, %v113_v17 }
   0xc   :  { %v42_v34 = vrot.slane %v32_v18, %v31_v8  ;;  %v46_v35 = vrot.slane %v36_v19, %v31_v8  ;;  %v147_v36 = vrot.slane %v137_v20, %v31_v8  ;;  %v151_v37 = vrot.slane %v141_v21, %v31_v8 }
   0xd   :  { %v68_v39 = vrot.slane %v58_v22, %v57_v12  ;;  %v72_v40 = vrot.slane %v62_v23, %v57_v12  ;;  %v169_v41 = vrot.slane %v159_v24, %v57_v12  ;;  %v173_v42 = vrot.slane %v163_v25, %v57_v12 }
   0xe   :  { %v94_v44 = vrot.slane %v84_v26, %v83_v14  ;;  %v98_v45 = vrot.slane %v88_v27, %v83_v14  ;;  %v191_v46 = vrot.slane %v181_v28, %v83_v14  ;;  %v195_v47 = vrot.slane %v185_v29, %v83_v14 }
   0xf   :  { %v120_v48 = vrot.slane %v110_v30, %v316_v16  ;;  %v124_v49 = vrot.slane %v114_v31, %v316_v16  ;;  %v213_v50 = vrot.slane %v203_v32, %v316_v16  ;;  %v217_v51 = vrot.slane %v207_v33, %v316_v16 }
  0x81   :  { %v26_v38 = vpop.permute.xlu0 %25  ;;  %v53_v43 = vpop.permute.xlu1 %52 }
  0x82   :  { %v47_v52 = vmul.f32 %v42_v34, %v26_v38  ;;  %v48_v53 = vmul.f32 %v46_v35, %v26_v38  ;;  %v152_v54 = vmul.f32 %v147_v36, %v26_v38  ;;  %v153_v55 = vmul.f32 %v151_v37, %v26_v38 }
  0x83   :  { %v73_v56 = vmul.f32 %v68_v39, %v53_v43  ;;  %v74_v57 = vmul.f32 %v72_v40, %v53_v43  ;;  %v174_v58 = vmul.f32 %v169_v41, %v53_v43  ;;  %v175_v59 = vmul.f32 %v173_v42, %v53_v43 }
  0x85   :  { %v20_v60 = vpop.permute.xlu0 %19 }
  0x86   :  { %v49_v61 = vadd.f32 %v47_v52, %v20_v60  ;;  %v50_v62 = vadd.f32 %v48_v53, %v20_v60  ;;  %v154_v63 = vadd.f32 %v152_v54, %v20_v60  ;;  %v155_v0 = vadd.f32 %v153_v55, %v20_v60  ;;  %v79_v1 = vpop.permute.xlu1 %78 }
  0x87   :  { %v99_v2 = vmul.f32 %v94_v44, %v79_v1  ;;  %v100_v3 = vmul.f32 %v98_v45, %v79_v1  ;;  %v196_v4 = vmul.f32 %v191_v46, %v79_v1  ;;  %v197_v5 = vmul.f32 %v195_v47, %v79_v1 }
  0x88   :  { %v75_v6 = vadd.f32 %v73_v56, %v49_v61  ;;  %v76_v7 = vadd.f32 %v74_v57, %v50_v62  ;;  %v176_v8 = vadd.f32 %v174_v58, %v154_v63  ;;  %v177_v9 = vadd.f32 %v175_v59, %v155_v0 }
  0x8a   :  { %v101_v10 = vadd.f32 %v99_v2, %v75_v6  ;;  %v102_v11 = vadd.f32 %v100_v3, %v76_v7  ;;  %v198_v12 = vadd.f32 %v196_v4, %v176_v8  ;;  %v199_v13 = vadd.f32 %v197_v5, %v177_v9  ;;  %v105_v14 = vpop.permute.xlu0 %104 }
  0x8b   :  { %v125_v15 = vmul.f32 %v120_v48, %v105_v14  ;;  %v126_v16 = vmul.f32 %v124_v49, %v105_v14  ;;  %v218_v17 = vmul.f32 %v213_v50, %v105_v14  ;;  %v219_v18 = vmul.f32 %v217_v51, %v105_v14 }
  0x8d   :  { %v127_v19 = vadd.f32 %v125_v15, %v101_v10  ;;  %v128_v20 = vadd.f32 %v126_v16, %v102_v11  ;;  %v220_v21 = vadd.f32 %v218_v17, %v198_v12  ;;  %v221_v22 = vadd.f32 %v219_v18, %v199_v13 }
  0x8f   :  { %129 = vst [vmem:[#allocation2] sm:$0xff] %v127_v19  ;;  %130 = vst [vmem:[#allocation2 + $0x8] sm:$0xff] %v128_v20 }
  0x90   :  { %223 = vst [vmem:[#allocation2 + $0x10] sm:$0xff] %v220_v21  ;;  %224 = vst [vmem:[#allocation2 + $0x18] sm:$0xff] %v221_v22 }
  0x91   :  { %264 = shalt.err (!%p261_p4)
}
  0x92   :  { %s265_s22 = scalar_lea.hbm %s339_s3, 512 }
  0x93   :  { %p266_p5 = scmp.ne.s32.totalorder %s339_s3, %s265_s22  ;;  %p269_p6 = scmp.lt.u32.totalorder %s265_s22, %s339_s3 }
  0x95   :  { %p271_p7 = pnand %p269_p6, %p266_p5 }
  0x97   :  { %274 = shalt.err (!%p271_p7)
}
  0x98   :  { %s282_s27 = smov 256   ;;  %s283_s28 = smov 16  }
  0x99   :  { %236 = dma.vmem_to_hbm [thread:$0]  %s231_s2, 512, %s339_s3, [#allocation3], %s282_s27, %s282_s27, %s283_s28  }
  0x9a   :  { %275 = dma.done.wait [#allocation3], 512  }
  0x9b   :  { %276 = vsyncadd [#allocation3], 4294966784 }
  0x9c   :  { %240 = vsyncpa [#allocation3], 1 }

// kernel: tpu_custom_call.1
= control target key start
LH: loop header
LB: loop body
LE: loop exit
PB: predicated region body
PF: predicated region fallthrough
CT: control target
= control target key end

     0   :  { %v277_v1 = vmov 0   ;;  %v278_v2 = vmov 1   ;;  %s336_s0 = inlined_call_operand.vmem [shape: f32[2,4,256], index: 0, kind: input, shape index: {}]   ;;  %s337_s1 = inlined_call_operand.vmem [shape: f32[8,4], index: 1, kind: input, shape index: {}]   ;;  %s338_s2 = inlined_call_operand.vmem [shape: f32[8,1], index: 2, kind: input, shape index: {}]   ;;  %s339_s3 = inlined_call_operand.hbm [shape: f32[2,8,256], index: 3, kind: output, shape index: {}]  }
   0x1   :  { %v15_v0 = vld [vmem:[%s337_s1] sm:$0xff]  ;;  %249 = vset.pattern.permute.xlu0 %v277_v1  ;;  %250 = vset.pattern.permute.xlu1 %v278_v2 }
   0x2   :  { %8 = vsyncpa [#allocation3], 0  ;;  %25 = vperm.xlu0 %249, %v15_v0   ;;  %52 = vperm.xlu1 %250, %v15_v0   ;;  %v16_v3 = vld [vmem:[%s338_s2] sm:$0xff]  ;;  %v279_v4 = vmov 2   ;;  %v280_v5 = vmov 3   ;;  %v29_v6 = vlaneseq  ;;  %v241_v11 = vld [vmem:[%s336_s0 + $0x8] sm:$0xff] }
   0x3   :  { %v22_v10 = vld [vmem:[%s336_s0] sm:$0xff]  ;;  %s281_s0 = smov [#allocation2]  }
   0x4   :  { %v30_v7 = vshrl.u32 %v29_v6, 7  ;;  %s230_s2 = sshll.u32 %s281_s0, 4  ;;  %s231_s2 = int_to_ptr.vmem [resolvable:$true] %s230_s2 }
   0x5   :  { %s253_s19 = scalar_lea.vmem %s231_s2, 512  ;;  %p258_p1 = scmp.lt.s32.totalorder %s231_s2, %s231_s2 }
   0x6   :  { %19 = vperm.xlu0 %249, %v16_v3   ;;  %251 = vset.pattern.permute.xlu1 %v279_v4  ;;  %v31_v8 = vsub.s32 0, %v30_v7  ;;  %v35_v9 = vsub.s32 4, %v30_v7  ;;  %v57_v12 = vsub.s32 1, %v30_v7  ;;  %v61_v13 = vsub.s32 5, %v30_v7  ;;  %p254_p0 = scmp.ne.s32.totalorder %s231_s2, %s253_s19  ;;  %p259_p2 = scmp.lt.s32.totalorder %s253_s19, %s253_s19 }
   0x7   :  { %78 = vperm.xlu1 %251, %v15_v0   ;;  %v83_v14 = vsub.s32 2, %v30_v7  ;;  %v87_v15 = vsub.s32 6, %v30_v7  ;;  %v316_v16 = vsub.s32 3, %v30_v7  ;;  %v113_v17 = vsub.s32 7, %v30_v7 }
   0x8   :  { %v32_v18 = vrot.slane %v22_v10, %v31_v8  ;;  %v36_v19 = vrot.slane %v22_v10, %v35_v9  ;;  %v137_v20 = vrot.slane %v241_v11, %v31_v8  ;;  %v141_v21 = vrot.slane %v241_v11, %v35_v9  ;;  %p260_p3 = por %p259_p2, %p258_p1 }
   0x9   :  { %v58_v22 = vrot.slane %v22_v10, %v57_v12  ;;  %v62_v23 = vrot.slane %v22_v10, %v61_v13  ;;  %v159_v24 = vrot.slane %v241_v11, %v57_v12  ;;  %v163_v25 = vrot.slane %v241_v11, %v61_v13 }
   0xa   :  { %252 = vset.pattern.permute.xlu0 %v280_v5  ;;  %v84_v26 = vrot.slane %v22_v10, %v83_v14  ;;  %v88_v27 = vrot.slane %v22_v10, %v87_v15  ;;  %v181_v28 = vrot.slane %v241_v11, %v83_v14  ;;  %v185_v29 = vrot.slane %v241_v11, %v87_v15  ;;  %p261_p4 = pnand %p260_p3, %p254_p0 }
   0xb   :  { %104 = vperm.xlu0 %252, %v15_v0   ;;  %v110_v30 = vrot.slane %v22_v10, %v316_v16  ;;  %v114_v31 = vrot.slane %v22_v10, %v113_v17  ;;  %v203_v32 = vrot.slane %v241_v11, %v316_v16  ;;  %v207_v33 = vrot.slane %v241_v11, %v113_v17 }
   0xc   :  { %v42_v34 = vrot.slane %v32_v18, %v31_v8  ;;  %v46_v35 = vrot.slane %v36_v19, %v31_v8  ;;  %v147_v36 = vrot.slane %v137_v20, %v31_v8  ;;  %v151_v37 = vrot.slane %v141_v21, %v31_v8 }
   0xd   :  { %v68_v39 = vrot.slane %v58_v22, %v57_v12  ;;  %v72_v40 = vrot.slane %v62_v23, %v57_v12  ;;  %v169_v41 = vrot.slane %v159_v24, %v57_v12  ;;  %v173_v42 = vrot.slane %v163_v25, %v57_v12 }
   0xe   :  { %v94_v44 = vrot.slane %v84_v26, %v83_v14  ;;  %v98_v45 = vrot.slane %v88_v27, %v83_v14  ;;  %v191_v46 = vrot.slane %v181_v28, %v83_v14  ;;  %v195_v47 = vrot.slane %v185_v29, %v83_v14 }
   0xf   :  { %v120_v48 = vrot.slane %v110_v30, %v316_v16  ;;  %v124_v49 = vrot.slane %v114_v31, %v316_v16  ;;  %v213_v50 = vrot.slane %v203_v32, %v316_v16  ;;  %v217_v51 = vrot.slane %v207_v33, %v316_v16 }
  0x81   :  { %v26_v38 = vpop.permute.xlu0 %25  ;;  %v53_v43 = vpop.permute.xlu1 %52 }
  0x82   :  { %v47_v52 = vmul.f32 %v42_v34, %v26_v38  ;;  %v48_v53 = vmul.f32 %v46_v35, %v26_v38  ;;  %v152_v54 = vmul.f32 %v147_v36, %v26_v38  ;;  %v153_v55 = vmul.f32 %v151_v37, %v26_v38 }
  0x83   :  { %v73_v56 = vmul.f32 %v68_v39, %v53_v43  ;;  %v74_v57 = vmul.f32 %v72_v40, %v53_v43  ;;  %v174_v58 = vmul.f32 %v169_v41, %v53_v43  ;;  %v175_v59 = vmul.f32 %v173_v42, %v53_v43 }
  0x85   :  { %v20_v60 = vpop.permute.xlu0 %19 }
  0x86   :  { %v49_v61 = vadd.f32 %v47_v52, %v20_v60  ;;  %v50_v62 = vadd.f32 %v48_v53, %v20_v60  ;;  %v154_v63 = vadd.f32 %v152_v54, %v20_v60  ;;  %v155_v0 = vadd.f32 %v153_v55, %v20_v60  ;;  %v79_v1 = vpop.permute.xlu1 %78 }
  0x87   :  { %v99_v2 = vmul.f32 %v94_v44, %v79_v1  ;;  %v100_v3 = vmul.f32 %v98_v45, %v79_v1  ;;  %v196_v4 = vmul.f32 %v191_v46, %v79_v1  ;;  %v197_v5 = vmul.f32 %v195_v47, %v79_v1 }
  0x88   :  { %v75_v6 = vadd.f32 %v73_v56, %v49_v61  ;;  %v76_v7 = vadd.f32 %v74_v57, %v50_v62  ;;  %v176_v8 = vadd.f32 %v174_v58, %v154_v63  ;;  %v177_v9 = vadd.f32 %v175_v59, %v155_v0 }
  0x8a   :  { %v101_v10 = vadd.f32 %v99_v2, %v75_v6  ;;  %v102_v11 = vadd.f32 %v100_v3, %v76_v7  ;;  %v198_v12 = vadd.f32 %v196_v4, %v176_v8  ;;  %v199_v13 = vadd.f32 %v197_v5, %v177_v9  ;;  %v105_v14 = vpop.permute.xlu0 %104 }
  0x8b   :  { %v125_v15 = vmul.f32 %v120_v48, %v105_v14  ;;  %v126_v16 = vmul.f32 %v124_v49, %v105_v14  ;;  %v218_v17 = vmul.f32 %v213_v50, %v105_v14  ;;  %v219_v18 = vmul.f32 %v217_v51, %v105_v14 }
  0x8d   :  { %v127_v19 = vadd.f32 %v125_v15, %v101_v10  ;;  %v128_v20 = vadd.f32 %v126_v16, %v102_v11  ;;  %v220_v21 = vadd.f32 %v218_v17, %v198_v12  ;;  %v221_v22 = vadd.f32 %v219_v18, %v199_v13 }
  0x8f   :  { %129 = vst [vmem:[#allocation2] sm:$0xff] %v127_v19  ;;  %130 = vst [vmem:[#allocation2 + $0x8] sm:$0xff] %v128_v20 }
  0x90   :  { %223 = vst [vmem:[#allocation2 + $0x10] sm:$0xff] %v220_v21  ;;  %224 = vst [vmem:[#allocation2 + $0x18] sm:$0xff] %v221_v22 }
  0x91   :  { %264 = shalt.err (!%p261_p4)
}
  0x92   :  { %s265_s22 = scalar_lea.hbm %s339_s3, 512 }
  0x93   :  { %p266_p5 = scmp.ne.s32.totalorder %s339_s3, %s265_s22  ;;  %p269_p6 = scmp.lt.u32.totalorder %s265_s22, %s339_s3 }
  0x95   :  { %p271_p7 = pnand %p269_p6, %p266_p5 }
  0x97   :  { %274 = shalt.err (!%p271_p7)
}
  0x98   :  { %s282_s27 = smov 256   ;;  %s283_s28 = smov 16  }
  0x99   :  { %236 = dma.vmem_to_hbm [thread:$0]  %s231_s2, 512, %s339_s3, [#allocation3], %s282_s27, %s282_s27, %s283_s28  }
  0x9a   :  { %275 = dma.done.wait [#allocation3], 512  }
  0x9b   :  { %276 = vsyncadd [#allocation3], 4294966784 }
  0x9c   :  { %240 = vsyncpa [#allocation3], 1 }

</bundles_post_ra>
